<compile_context>
chip_gen: v5e
topology: v5e:2x2
jax: 0.10.0
libtpu: 0.0.40
codegen_flags: <defaults>
</compile_context>

<pallas_src>
import functools

import jax
import jax.numpy as jnp
from jax import lax
from jax.experimental import pallas as pl
from jax.experimental.pallas import tpu as pltpu


def _round_up(x, m):
    return (x + m - 1) // m * m


def _bert_self_output_kernel(x_ref, res_ref, w_ref, b_ref, g_ref, beta_ref,
                             o_ref, *, eps):
    # x_ref:   (TM, H)  hidden_states tile (native dtype)
    # res_ref: (TM, H)  residual (input_tensor) tile
    # w_ref:   (H, H)   dense weight, already (in, out) so y = x @ w
    # b_ref:   (1, H)   dense bias
    # g_ref:   (1, H)   layernorm gamma
    # beta_ref:(1, H)   layernorm beta

    # MXU matmul in the native dtype (bf16/f32) with f32 accumulation.
    h = jnp.dot(x_ref[...], w_ref[...], preferred_element_type=jnp.float32)
    h = h + b_ref[...].astype(jnp.float32)

    # TODO(synk): dropout is identity in eval mode; training-mode dropout
    # (pltpu.prng_random_bits mask) is not implemented here.

    # Residual add (f32 epilogue).
    y = h + res_ref[...].astype(jnp.float32)

    # LayerNorm over the hidden (lane) axis.  Single pass: sum and sum-of-
    # squares (both cross-lane reductions go to the XLU); keep the (y - mean)
    # subtraction form for the normalization.
    inv_h = 1.0 / y.shape[-1]
    mean = jnp.sum(y, axis=-1, keepdims=True) * inv_h
    mean_sq = jnp.sum(y * y, axis=-1, keepdims=True) * inv_h
    var = jnp.maximum(mean_sq - mean * mean, 0.0)
    y_norm = (y - mean) * lax.rsqrt(var + eps)
    out = (y_norm * g_ref[...].astype(jnp.float32)
           + beta_ref[...].astype(jnp.float32))

    o_ref[...] = out.astype(o_ref.dtype)


def prepare_params(dense_w, dense_b, ln_g, ln_b, *, param_dtype=None):
    """One-time param prep: hoists the nn.Linear weight transpose out of the
    per-call path (weight stored as (in, out) so the kernel does y = x @ w)."""
    hidden = dense_w.shape[0]
    if param_dtype is None:
        param_dtype = dense_w.dtype
    return {
        "w_t": jnp.asarray(dense_w, param_dtype).T,          # (in, out)
        "b": jnp.asarray(dense_b).reshape(1, hidden),
        "gamma": jnp.asarray(ln_g).reshape(1, hidden),
        "beta": jnp.asarray(ln_b).reshape(1, hidden),
    }


def _choose_row_tile(n_rows, hidden, act_bytes, w_bytes, requested):
    # Sublane alignment: f32 tiles need row multiples of 8, bf16 of 16.
    sublane = 8 if act_bytes >= 4 else 16
    tm = max(sublane, _round_up(min(requested, max(n_rows, 1)), sublane))

    # Conservative VMEM budget (safe for v7x's 64 MiB physical VMEM):
    # resident weight (double-buffered allocation) + 3 double-buffered
    # activation streams + slack for the f32 LayerNorm intermediates.
    budget = 40 * 1024 * 1024
    weight_cost = 2 * hidden * hidden * w_bytes

    def cost(t):
        streams = 2 * 3 * t * hidden * act_bytes
        f32_tmp = 2 * t * hidden * 4
        return weight_cost + streams + f32_tmp

    while tm > sublane and cost(tm) > budget:
        tm = max(sublane, _round_up(tm // 2, sublane))
    return tm


def bert_self_output(hidden_states, input_tensor, params, *, eps=1e-12,
                     row_tile=512):
    """hidden_states, input_tensor: (..., hidden).  Returns the same shape."""
    orig_shape = hidden_states.shape
    hidden = orig_shape[-1]
    hs = hidden_states.reshape(-1, hidden)
    res = input_tensor.reshape(-1, hidden)
    n_rows = hs.shape[0]

    w_t = params["w_t"]
    bias, gamma, beta = params["b"], params["gamma"], params["beta"]

    act_bytes = jnp.dtype(hidden_states.dtype).itemsize
    w_bytes = jnp.dtype(w_t.dtype).itemsize
    tm = _choose_row_tile(n_rows, hidden, act_bytes, w_bytes, row_tile)

    # Pad rows to a multiple of the tile (padded rows are sliced off below).
    n_pad = _round_up(n_rows, tm)
    if n_pad != n_rows:
        pad = n_pad - n_rows
        hs = jnp.pad(hs, ((0, pad), (0, 0)))
        res = jnp.pad(res, ((0, pad), (0, 0)))

    grid = (n_pad // tm,)
    kernel = functools.partial(_bert_self_output_kernel, eps=eps)

    # Scoped-VMEM limit sized to the working set, capped under v7x's 64 MiB.
    workset = (2 * hidden * hidden * w_bytes
               + 2 * 3 * tm * hidden * act_bytes
               + 4 * tm * hidden * 4)
    vmem_limit = int(min(48 * 1024 * 1024, max(16 * 1024 * 1024, workset)))

    out = pl.pallas_call(
        kernel,
        out_shape=jax.ShapeDtypeStruct((n_pad, hidden), hidden_states.dtype),
        grid_spec=pltpu.PrefetchScalarGridSpec(
            num_scalar_prefetch=0,
            grid=grid,
            in_specs=[
                pl.BlockSpec((tm, hidden), lambda i: (i, 0)),       # hidden tile
                pl.BlockSpec((tm, hidden), lambda i: (i, 0)),       # residual tile
                pl.BlockSpec((hidden, hidden), lambda i: (0, 0)),   # weight (resident)
                pl.BlockSpec((1, hidden), lambda i: (0, 0)),        # bias
                pl.BlockSpec((1, hidden), lambda i: (0, 0)),        # gamma
                pl.BlockSpec((1, hidden), lambda i: (0, 0)),        # beta
            ],
            out_specs=pl.BlockSpec((tm, hidden), lambda i: (i, 0)),
        ),
        compiler_params=pltpu.CompilerParams(
            dimension_semantics=("parallel",),
            vmem_limit_bytes=vmem_limit),
    )(hs, res, w_t, bias, gamma, beta)

    if n_pad != n_rows:
        out = out[:n_rows]
    return out.reshape(orig_shape)


def _reference(hidden_states, input_tensor, dense_w, dense_b, ln_g, ln_b,
               eps=1e-12):
    hs = hidden_states.astype(jnp.float32)
    res = input_tensor.astype(jnp.float32)
    h = hs @ dense_w.astype(jnp.float32).T + dense_b.astype(jnp.float32)
    y = h + res
    mean = jnp.mean(y, axis=-1, keepdims=True)
    var = jnp.mean(jnp.square(y - mean), axis=-1, keepdims=True)
    yn = (y - mean) / jnp.sqrt(var + eps)
    return yn * ln_g + ln_b


if __name__ == "__main__":
    # Small config consistent with the module's forward: (batch, seq, hidden).
    batch, seq, hidden = 2, 8, 32
    key = jax.random.PRNGKey(0)
    k_hs, k_in, k_w, k_b, k_g, k_beta = jax.random.split(key, 6)

    hidden_states = jax.random.normal(k_hs, (batch, seq, hidden), jnp.float32)
    input_tensor = jax.random.normal(k_in, (batch, seq, hidden), jnp.float32)

    # nn.Linear(hidden, hidden): weight (out, in), bias (out,)
    dense_w = jax.random.normal(k_w, (hidden, hidden), jnp.float32) * 0.02
    dense_b = jax.random.normal(k_b, (hidden,), jnp.float32) * 0.02
    # LayerNorm affine params
    ln_g = 1.0 + 0.1 * jax.random.normal(k_g, (hidden,), jnp.float32)
    ln_b = 0.1 * jax.random.normal(k_beta, (hidden,), jnp.float32)

    params = prepare_params(dense_w, dense_b, ln_g, ln_b)

    out = bert_self_output(hidden_states, input_tensor, params)
    out = jax.block_until_ready(out)

    ref = _reference(hidden_states, input_tensor, dense_w, dense_b, ln_g, ln_b)
    assert out.shape == (batch, seq, hidden), out.shape
    assert jnp.allclose(out, ref, atol=1e-4, rtol=1e-4), \
        float(jnp.max(jnp.abs(out - ref)))

    print("KERNEL_OK")
</pallas_src>

<mosaic_0001>
module attributes {stable_mosaic.version = 11 : i64} {
  func.func @_bert_self_output_kernel(%arg0: i32, %arg1: memref<16x32xf32, #tpu.memory_space<vmem>>, %arg2: memref<16x32xf32, #tpu.memory_space<vmem>>, %arg3: memref<32x32xf32, #tpu.memory_space<vmem>>, %arg4: memref<1x32xf32, #tpu.memory_space<vmem>>, %arg5: memref<1x32xf32, #tpu.memory_space<vmem>>, %arg6: memref<1x32xf32, #tpu.memory_space<vmem>>, %arg7: memref<16x32xf32, #tpu.memory_space<vmem>>) attributes {dimension_semantics = [#tpu.dimension_semantics<parallel>], iteration_bounds = array<i64: 1>, scalar_prefetch = 0 : i64, scratch_operands = 0 : i64, tpu.core_type = #tpu.core_type<tc>, window_params = [{transform_indices = @transform_0, window_bounds = array<i64: 16, 32>}, {transform_indices = @transform_1, window_bounds = array<i64: 16, 32>}, {pipeline_mode = #tpu.pipeline_mode<synchronous>, transform_indices = @transform_2, window_bounds = array<i64: 32, 32>}, {pipeline_mode = #tpu.pipeline_mode<synchronous>, transform_indices = @transform_3, window_bounds = array<i64: 1, 32>}, {pipeline_mode = #tpu.pipeline_mode<synchronous>, transform_indices = @transform_4, window_bounds = array<i64: 1, 32>}, {pipeline_mode = #tpu.pipeline_mode<synchronous>, transform_indices = @transform_5, window_bounds = array<i64: 1, 32>}, {transform_indices = @transform_6, window_bounds = array<i64: 16, 32>}]} {
    %c0 = arith.constant 0 : index
    %c0_0 = arith.constant 0 : index
    %0 = vector.load %arg1[%c0, %c0_0] : memref<16x32xf32, #tpu.memory_space<vmem>>, vector<16x32xf32>
    %c0_1 = arith.constant 0 : index
    %c0_2 = arith.constant 0 : index
    %1 = vector.load %arg3[%c0_1, %c0_2] : memref<32x32xf32, #tpu.memory_space<vmem>>, vector<32x32xf32>
    %cst = arith.constant dense<0.000000e+00> : vector<16x32xf32>
    %2 = tpu.matmul %0, %1, %cst {dimension_numbers = #tpu.dot_dimension_numbers<[1], [0], [0], [1], [0, 0, 1, 1], [], []>} : vector<16x32xf32>, vector<32x32xf32>, vector<16x32xf32> -> vector<16x32xf32>
    %c0_3 = arith.constant 0 : index
    %c0_4 = arith.constant 0 : index
    %3 = vector.load %arg4[%c0_3, %c0_4] : memref<1x32xf32, #tpu.memory_space<vmem>>, vector<1x32xf32>
    %4 = vector.broadcast %3 : vector<1x32xf32> to vector<16x32xf32>
    %5 = arith.addf %2, %4 : vector<16x32xf32>
    %c0_5 = arith.constant 0 : index
    %c0_6 = arith.constant 0 : index
    %6 = vector.load %arg2[%c0_5, %c0_6] : memref<16x32xf32, #tpu.memory_space<vmem>>, vector<16x32xf32>
    %7 = arith.addf %5, %6 : vector<16x32xf32>
    %cst_7 = arith.constant dense<0.000000e+00> : vector<16xf32>
    %8 = vector.multi_reduction <add>, %7, %cst_7 [1] : vector<16x32xf32> to vector<16xf32>
    %9 = vector.shape_cast %8 : vector<16xf32> to vector<16x1xf32>
    %cst_8 = arith.constant 3.125000e-02 : f32
    %10 = vector.broadcast %cst_8 : f32 to vector<16x1xf32>
    %11 = arith.mulf %9, %10 : vector<16x1xf32>
    %12 = arith.mulf %7, %7 : vector<16x32xf32>
    %cst_9 = arith.constant dense<0.000000e+00> : vector<16xf32>
    %13 = vector.multi_reduction <add>, %12, %cst_9 [1] : vector<16x32xf32> to vector<16xf32>
    %14 = vector.shape_cast %13 : vector<16xf32> to vector<16x1xf32>
    %cst_10 = arith.constant 3.125000e-02 : f32
    %15 = vector.broadcast %cst_10 : f32 to vector<16x1xf32>
    %16 = arith.mulf %14, %15 : vector<16x1xf32>
    %17 = arith.mulf %11, %11 : vector<16x1xf32>
    %18 = arith.subf %16, %17 : vector<16x1xf32>
    %cst_11 = arith.constant 0.000000e+00 : f32
    %19 = vector.broadcast %cst_11 : f32 to vector<16x1xf32>
    %20 = arith.maximumf %18, %19 : vector<16x1xf32>
    %21 = vector.broadcast %11 : vector<16x1xf32> to vector<16x32xf32>
    %22 = arith.subf %7, %21 : vector<16x32xf32>
    %cst_12 = arith.constant 9.99999996E-13 : f32
    %23 = vector.broadcast %cst_12 : f32 to vector<16x1xf32>
    %24 = arith.addf %20, %23 : vector<16x1xf32>
    %25 = math.rsqrt %24 : vector<16x1xf32>
    %26 = vector.broadcast %25 : vector<16x1xf32> to vector<16x32xf32>
    %27 = arith.mulf %22, %26 : vector<16x32xf32>
    %c0_13 = arith.constant 0 : index
    %c0_14 = arith.constant 0 : index
    %28 = vector.load %arg5[%c0_13, %c0_14] : memref<1x32xf32, #tpu.memory_space<vmem>>, vector<1x32xf32>
    %29 = vector.broadcast %28 : vector<1x32xf32> to vector<16x32xf32>
    %30 = arith.mulf %27, %29 : vector<16x32xf32>
    %c0_15 = arith.constant 0 : index
    %c0_16 = arith.constant 0 : index
    %31 = vector.load %arg6[%c0_15, %c0_16] : memref<1x32xf32, #tpu.memory_space<vmem>>, vector<1x32xf32>
    %32 = vector.broadcast %31 : vector<1x32xf32> to vector<16x32xf32>
    %33 = arith.addf %30, %32 : vector<16x32xf32>
    %c0_17 = arith.constant 0 : index
    %c0_18 = arith.constant 0 : index
    %34 = vector.load %arg7[%c0_17, %c0_18] : memref<16x32xf32, #tpu.memory_space<vmem>>, vector<16x32xf32>
    tpu.vector_store %arg7[%c0_17, %c0_18], %33 {strides = array<i32>} : memref<16x32xf32, #tpu.memory_space<vmem>>, vector<16x32xf32>,
    return
  }
  func.func @transform_0(%arg0: i32) -> (i32, i32) {
    %c0_i32 = arith.constant 0 : i32
    %c0_i32_0 = arith.constant 0 : i32
    return %arg0, %c0_i32 : i32, i32
  }
  func.func @transform_1(%arg0: i32) -> (i32, i32) {
    %c0_i32 = arith.constant 0 : i32
    %c0_i32_0 = arith.constant 0 : i32
    return %arg0, %c0_i32 : i32, i32
  }
  func.func @transform_2(%arg0: i32) -> (i32, i32) {
    %c0_i32 = arith.constant 0 : i32
    %c0_i32_0 = arith.constant 0 : i32
    %c0_i32_1 = arith.constant 0 : i32
    return %c0_i32, %c0_i32_0 : i32, i32
  }
  func.func @transform_3(%arg0: i32) -> (i32, i32) {
    %c0_i32 = arith.constant 0 : i32
    %c0_i32_0 = arith.constant 0 : i32
    %c0_i32_1 = arith.constant 0 : i32
    return %c0_i32, %c0_i32_0 : i32, i32
  }
  func.func @transform_4(%arg0: i32) -> (i32, i32) {
    %c0_i32 = arith.constant 0 : i32
    %c0_i32_0 = arith.constant 0 : i32
    %c0_i32_1 = arith.constant 0 : i32
    return %c0_i32, %c0_i32_0 : i32, i32
  }
  func.func @transform_5(%arg0: i32) -> (i32, i32) {
    %c0_i32 = arith.constant 0 : i32
    %c0_i32_0 = arith.constant 0 : i32
    %c0_i32_1 = arith.constant 0 : i32
    return %c0_i32, %c0_i32_0 : i32, i32
  }
  func.func @transform_6(%arg0: i32) -> (i32, i32) {
    %c0_i32 = arith.constant 0 : i32
    %c0_i32_0 = arith.constant 0 : i32
    return %arg0, %c0_i32 : i32, i32
  }
}

</mosaic_0001>

<bundles_post_ra>
// kernel: tpu_custom_call.1
= control target key start
LH: loop header
LB: loop body
LE: loop exit
PB: predicated region body
PF: predicated region fallthrough
CT: control target
= control target key end

     0   :  { %11 = vsyncpa [#allocation3], 0  ;;  %s402_s0 = inlined_call_operand.hbm [shape: f32[16,32], index: 0, kind: input, shape index: {}]   ;;  %s403_s1 = inlined_call_operand.hbm [shape: f32[16,32], index: 1, kind: input, shape index: {}]   ;;  %s404_s2 = inlined_call_operand.hbm [shape: f32[32,32], index: 2, kind: input, shape index: {}]   ;;  %s405_s3 = inlined_call_operand.vmem [shape: f32[1,32], index: 3, kind: input, shape index: {}]   ;;  %s406_s4 = inlined_call_operand.vmem [shape: f32[1,32], index: 4, kind: input, shape index: {}]   ;;  %s407_s5 = inlined_call_operand.vmem [shape: f32[1,32], index: 5, kind: input, shape index: {}]   ;;  %s408_s6 = inlined_call_operand.hbm [shape: f32[16,32], index: 6, kind: output, shape index: {}]  }
   0x1   :  { %12 = vsyncpa [#allocation6], 0 }
   0x2   :  { %13 = vsyncpa [#allocation4], 0  ;;  %s31_s23 = sshll.u32 %s403_s1, 4  ;;  %s320_s24 = smov [#allocation5]   ;;  %s32_s23 = int_to_ptr.hbm [resolvable:$true] %s31_s23 }
   0x3   :  { %s33_s25 = sshll.u32 %s320_s24, 4  ;;  %s18_s28 = sshll.u32 %s402_s0, 4  ;;  %s34_s25 = int_to_ptr.vmem [resolvable:$true] %s33_s25  ;;  %s19_s28 = int_to_ptr.hbm [resolvable:$true] %s18_s28 }
   0x4   :  { %s321_s29 = smov 128   ;;  %s322_s30 = smov 8  }
   0x5   :  { %39 = dma.hbm_to_vmem [thread:$0]  %s32_s23, 256, %s34_s25, [#allocation6], %s321_s29, %s321_s29, %s322_s30  }
   0x6   :  { %s323_s7 = smov [#allocation2]   ;;  %s44_s1 = sshll.u32 %s404_s2, 4  ;;  %s45_s1 = int_to_ptr.hbm [resolvable:$true] %s44_s1 }
   0x7   :  { %s20_s8 = sshll.u32 %s323_s7, 4  ;;  %s324_s0 = smov [#allocation7]   ;;  %s21_s8 = int_to_ptr.vmem [resolvable:$true] %s20_s8 }
   0x8   :  { %26 = dma.hbm_to_vmem [thread:$0]  %s19_s28, 256, %s21_s8, [#allocation3], %s321_s29, %s321_s29, %s322_s30  }
   0x9   :  { %s46_s11 = sshll.u32 %s324_s0, 4  ;;  %s47_s11 = int_to_ptr.vmem [resolvable:$true] %s46_s11 }
   0xa   :  { %52 = dma.hbm_to_vmem [thread:$0]  %s45_s1, 512, %s47_s11, [#allocation6], %s321_s29, %s321_s29, %s322_s30  }
   0xb   :  { %314 = dma.done.wait [#allocation3], 256  }
   0xc   :  { %315 = vsyncadd [#allocation3], 4294967040 }
   0xd   :  { %316 = dma.done.wait [#allocation6], 768  }
   0xe   :  { %317 = vsyncadd [#allocation6], 4294966528  ;;  %v76_v0 = vld [vmem:[#allocation7 + $0x18] sm:$0xff]  ;;  %v75_v1 = vld [vmem:[#allocation7 + $0x10] sm:$0xff]  ;;  %vm81_vm0 = vcmask 261120   ;;  %s185_s19 = sshll.u32 %s408_s6, 4  ;;  %s186_s19 = int_to_ptr.hbm [resolvable:$true] %s185_s19 }
   0xf   :  { %100 = vmatpush.msra.mxu0 %v76_v0  ;;  %201 = vmatpush.msra.mxu1 %v76_v0  ;;  %v74_v2 = vld [vmem:[#allocation7 + $0x8] sm:$0xff]  ;;  %v73_v3 = vld [vmem:[#allocation7] sm:$0xff]  ;;  %v111_v8 = vld [vmem:[#allocation5] sm:$0xff] }
  0x10   :  { %v71_v4 = vld [vmem:[#allocation2] sm:$0xff]  ;;  %v72_v5 = vld [vmem:[#allocation2 + $0x8] sm:$0xff]  ;;  %v112_v12 = vld [vmem:[#allocation5 + $0x8] sm:$0xff] }
  0x11   :  { %101 = vmatpush.msra.mxu0 %v75_v1  ;;  %202 = vmatpush.msra.mxu1 %v75_v1  ;;  %v211_v6 = vld [vmem:[%s405_s3] ss:$0 sm:$0xff] }
  0x12   :  { %v212_v46 = vld [vmem:[%s406_s4] ss:$0 sm:$0xff]  ;;  %s325_s4 = smov [#allocation8]  }
  0x13   :  { %102 = vmatpush.msra.mxu0 %v74_v2  ;;  %203 = vmatpush.msra.mxu1 %v74_v2  ;;  %v213_v50 = vld [vmem:[%s407_s5] ss:$0 sm:$0xff]  ;;  %s183_s16 = sshll.u32 %s325_s4, 4  ;;  %s184_s16 = int_to_ptr.vmem [resolvable:$true] %s183_s16 }
  0x15   :  { %103 = vmatpush.msra.mxu0 %v73_v3  ;;  %204 = vmatpush.msra.mxu1 %v73_v3 }
  0x16   :  { %199 = vmatmul.msk.f32.vlgmr.msra.gmra.mxu0 %vm81_vm0, %v71_v4  ;;  %200 = vmatmul.msk.f32.vlgmr.msra.gmra.mxu1 %vm81_vm0, %v72_v5 }
  0x93   :  { %v105_v7 = vpop.f32.mrf.mxu0  ;;  %v108_v9 = vpop.f32.mrf.mxu1 }
  0x94   :  { %v106_v10 = vadd.f32 %v211_v6, %v105_v7  ;;  %v109_v11 = vadd.f32 %v211_v6, %v108_v9 }
  0x96   :  { %v113_v13 = vadd.f32 %v111_v8, %v106_v10  ;;  %v114_v15 = vadd.f32 %v112_v12, %v109_v11 }
  0x98   :  { %v115_v14 = vsel %vm81_vm0, %v113_v13, 0.0  ;;  %v123_v16 = vmul.f32 %v113_v13, %v113_v13  ;;  %v124_v18 = vmul.f32 %v114_v15, %v114_v15  ;;  %v118_v19 = vsel %vm81_vm0, %v114_v15, 0.0 }
  0x99   :  { %116 = vadd.xlane.f32.xlu0 %v115_v14 }
  0x9a   :  { %v125_v17 = vsel %vm81_vm0, %v123_v16, 0.0  ;;  %v128_v20 = vsel %vm81_vm0, %v124_v18, 0.0 }
  0x9b   :  { %126 = vadd.xlane.f32.xlu1 %v125_v17 }
  0xa1   :  { %119 = vadd.xlane.f32.xlu0 %v118_v19 }
  0xa3   :  { %129 = vadd.xlane.f32.xlu1 %v128_v20 }
 0x10c   :  { %v117_v21 = vpop.xlane.xlu0 %116 }
 0x10d   :  { %v121_v22 = vmul.f32 0.03125, %v117_v21 }
 0x10e   :  { %v127_v23 = vpop.xlane.xlu1 %126 }
 0x10f   :  { %v133_v24 = vmul.f32 %v121_v22, %v121_v22  ;;  %v131_v25 = vmul.f32 0.03125, %v127_v23  ;;  %v139_v44 = vsub.f32 %v113_v13, %v121_v22 }
 0x111   :  { %v135_v26 = vsub.f32 %v131_v25, %v133_v24 }
 0x113   :  { %v137_v27 = vmax.f32 %v135_v26, 0.0 }
 0x114   :  { %v120_v28 = vpop.xlane.xlu0 %119 }
 0x115   :  { %v141_v29 = vadd.f32 1e-12, %v137_v27  ;;  %v122_v30 = vmul.f32 0.03125, %v120_v28 }
 0x116   :  { %v130_v31 = vpop.xlane.xlu1 %129 }
 0x117   :  { %214 = vrsqrt.f32 %v141_v29  ;;  %v134_v32 = vmul.f32 %v122_v30, %v122_v30  ;;  %v132_v33 = vmul.f32 0.03125, %v130_v31  ;;  %vm149_vm2 = vweird.f32 %v141_v29 }
 0x118   :  { %v140_v56 = vsub.f32 %v114_v15, %v122_v30 }
 0x119   :  { %v136_v34 = vsub.f32 %v132_v33, %v134_v32 }
 0x11b   :  { %v138_v35 = vmax.f32 %v136_v34, 0.0 }
 0x11d   :  { %v215_v36 = vpop.eup %214  ;;  %v142_v38 = vadd.f32 1e-12, %v138_v35 }
 0x11e   :  { %v144_v37 = vmul.f32 %v215_v36, %v141_v29  ;;  %vm150_vm1 = vweird.f32 %v215_v36 }
 0x11f   :  { %216 = vrsqrt.f32 %v142_v38  ;;  %vm151_vm3 = vmor %vm149_vm2, %vm150_vm1  ;;  %vm159_vm5 = vweird.f32 %v142_v38 }
 0x120   :  { %v145_v39 = vmul.f32 %v215_v36, %v144_v37 }
 0x122   :  { %v146_v40 = vmul.f32 0.5, %v145_v39 }
 0x124   :  { %v147_v41 = vsub.f32 1.5, %v146_v40 }
 0x125   :  { %v217_v42 = vpop.eup %216 }
 0x126   :  { %v148_v43 = vmul.f32 %v215_v36, %v147_v41  ;;  %v154_v45 = vmul.f32 %v217_v42, %v142_v38  ;;  %vm160_vm4 = vweird.f32 %v217_v42 }
 0x127   :  { %vm161_vm6 = vmor %vm159_vm5, %vm160_vm4 }
 0x128   :  { %v152_v47 = vsel %vm151_vm3, %v215_v36, %v148_v43  ;;  %v155_v49 = vmul.f32 %v217_v42, %v154_v45 }
 0x129   :  { %v163_v48 = vmul.f32 %v152_v47, %v139_v44 }
 0x12a   :  { %v156_v51 = vmul.f32 0.5, %v155_v49 }
 0x12b   :  { %v169_v52 = vmul.f32 %v212_v46, %v163_v48 }
 0x12c   :  { %v157_v53 = vsub.f32 1.5, %v156_v51 }
 0x12d   :  { %v175_v54 = vadd.f32 %v213_v50, %v169_v52 }
 0x12e   :  { %v158_v55 = vmul.f32 %v217_v42, %v157_v53 }
 0x12f   :  { %177 = vst.msk [vmem:[#allocation8] sm:$0xff] %vm81_vm0, %v175_v54 }
 0x130   :  { %v162_v57 = vsel %vm161_vm6, %v217_v42, %v158_v55 }
 0x131   :  { %v164_v58 = vmul.f32 %v162_v57, %v140_v56 }
 0x133   :  { %v170_v59 = vmul.f32 %v212_v46, %v164_v58 }
 0x135   :  { %v176_v60 = vadd.f32 %v213_v50, %v170_v59 }
 0x137   :  { %178 = vst.msk [vmem:[#allocation8 + $0x8] sm:$0xff] %vm81_vm0, %v176_v60 }
 0x138   :  { %191 = dma.vmem_to_hbm [thread:$0]  %s184_s16, 256, %s186_s19, [#allocation4], %s321_s29, %s321_s29, %s322_s30  }
 0x139   :  { %318 = dma.done.wait [#allocation4], 256  }
 0x13a   :  { %319 = vsyncadd [#allocation4], 4294967040 }
 0x13b   :  { %196 = vsyncpa [#allocation3], 1 }
 0x13c   :  { %197 = vsyncpa [#allocation6], 1 }
 0x13d   :  { %198 = vsyncpa [#allocation4], 1 }

</bundles_post_ra>
